<compile_context>
chip_gen: v7x
topology: tpu7x:2x2x1
jax: 0.10.0
libtpu: 0.0.40
codegen_flags: <defaults>
</compile_context>

<pallas_src>
import functools

import jax
import jax.numpy as jnp
from jax.experimental import pallas as pl
from jax.experimental.pallas import tpu as pltpu


def _pick_block(total, target, mult):
    """Largest divisor of `total` that is <= `target` and a multiple of `mult`
    (falls back to `total`, which is always a legal full-extent block)."""
    target = max(1, min(target, total))
    for cand in range(target, 0, -1):
        if total % cand == 0 and (cand % mult == 0 or cand == total):
            return cand
    return total


def _pointer_attention_kernel(dec_ref, enc_ref, mask_ref, vt_ref,
                              masked_ref, score_ref, *, h_chunk):
    """One grid step = one (batch, Td-tile) pair.

    Refs:
      dec_ref  : [1, td_tile, H]   decoder projection (dec @ W2^T) tile
      enc_ref  : [1, H, Te]        encoder projection (enc @ W1^T), Te on lanes
      mask_ref : [1, td_tile, Te]
      vt_ref   : [H, 1]            vt weights as a column
      masked_ref, score_ref : [1, td_tile, Te] outputs
    """
    td_tile = dec_ref.shape[1]
    H = dec_ref.shape[2]
    Te = enc_ref.shape[2]
    n_chunks = H // h_chunk

    acc = jnp.zeros((td_tile, Te), jnp.float32)
    # Stream H in chunks: live set is O(h_chunk * td_tile * Te) + one
    # [td_tile, Te] accumulator instead of the full [td_tile, Te, H] block.
    for c in range(n_chunks):                     # static, trace-time unrolled
        h0 = c * h_chunk
        h1 = h0 + h_chunk
        d = dec_ref[0, :, h0:h1]                  # [td_tile, hc]
        e = enc_ref[0, h0:h1, :]                  # [hc, Te]      (Te lane-dense)
        v = vt_ref[h0:h1, :]                      # [hc, 1]
        comb = jnp.tanh(d[:, :, None] + e[None, :, :])   # [td_tile, hc, Te]
        part = jnp.sum(comb * v[None, :, :], axis=1)     # [td_tile, Te]
        acc = acc + part.astype(jnp.float32)

    score_ref[0] = acc.astype(score_ref.dtype)
    masked_ref[0] = (acc + mask_ref[0].astype(jnp.float32)).astype(masked_ref.dtype)


def pointer_attention(decoder_state, encoder_outputs, mask, w1_t, w2_t, vt_w,
                      *, td_tile=128, h_chunk=128, compute_dtype=jnp.float32):
    """Pallas TPU implementation of PointerAttention.forward (additive path).

    Args:
      decoder_state:   [B, Td, H]
      encoder_outputs: [B, Te, H]
      mask:            [B, Td, Te]   (additive log-mask)
      w1_t: [H, H]  (W1.weight transposed, i.e. [in, out])
      w2_t: [H, H]  (W2.weight transposed)
      vt_w: [1, H]  (vt.weight)
      td_tile: rows of Td per grid step (multiple of 8; default 128).
      h_chunk: H slab streamed per accumulation step.
      compute_dtype: dtype for the broadcast-add + tanh (bf16 on v6e/v7x for
        ~2x EUP/VPU throughput and half the VMEM footprint; f32 on v5e / when
        exactness matters).  Accumulation is always f32.
    Returns:
      (log_score_masked, log_score), each [B, Td, Te] float32.

    Perf notes: Te should be a multiple of 128 so output stores are lane-dense.
    For very large Te, add a Te grid axis (also "parallel") to bound the
    [td_tile, Te] output tiles under the v7x 32 MiB scoped-VMEM default.
    """
    B, Td, H = decoder_state.shape
    _, Te, _ = encoder_outputs.shape

    # Projections hoisted to plain XLA batched matmuls (the per-tile M=8
    # matmuls underused the MXU and kept [H, H] weights resident in VMEM).
    # enc_tT is produced directly in [B, H, Te] layout -> Te is the lane axis
    # inside the kernel.
    enc_tT = jnp.einsum('beh,hk->bke', encoder_outputs, w1_t,
                        preferred_element_type=jnp.float32).astype(compute_dtype)
    dec_t = jnp.einsum('bdh,hk->bdk', decoder_state, w2_t,
                       preferred_element_type=jnp.float32).astype(compute_dtype)
    vt_col = vt_w.reshape(H, 1).astype(compute_dtype)

    td_tile = _pick_block(Td, td_tile, 8)
    h_chunk = _pick_block(H, h_chunk, 8)
    n_td = Td // td_tile

    out_shape = (
        jax.ShapeDtypeStruct((B, Td, Te), jnp.float32),
        jax.ShapeDtypeStruct((B, Td, Te), jnp.float32),
    )

    grid_spec = pltpu.PrefetchScalarGridSpec(
        num_scalar_prefetch=0,
        grid=(B, n_td),
        in_specs=[
            pl.BlockSpec((1, td_tile, H), lambda b, t: (b, t, 0)),   # dec @ W2^T
            pl.BlockSpec((1, H, Te), lambda b, t: (b, 0, 0)),        # (enc @ W1^T)^T
            pl.BlockSpec((1, td_tile, Te), lambda b, t: (b, t, 0)),  # mask
            pl.BlockSpec((H, 1), lambda b, t: (0, 0)),               # vt column
        ],
        out_specs=[
            pl.BlockSpec((1, td_tile, Te), lambda b, t: (b, t, 0)),
            pl.BlockSpec((1, td_tile, Te), lambda b, t: (b, t, 0)),
        ],
    )

    cdt = jnp.dtype(compute_dtype).itemsize
    cost = pl.CostEstimate(
        flops=3 * B * Td * Te * H + 2 * B * Td * Te,
        transcendentals=B * Td * Te * H,
        bytes_accessed=int(dec_t.size * cdt + enc_tT.size * cdt
                           + mask.size * mask.dtype.itemsize
                           + vt_col.size * cdt + 2 * B * Td * Te * 4),
    )

    kernel = functools.partial(_pointer_attention_kernel, h_chunk=h_chunk)

    return pl.pallas_call(
        kernel,
        out_shape=out_shape,
        grid_spec=grid_spec,
        compiler_params=pltpu.CompilerParams(
            # No scratch carry anymore -> both axes parallel (v7x 2-TC sharding).
            dimension_semantics=("parallel", "parallel")),
        cost_estimate=cost,
    )(dec_t, enc_tT, mask, vt_col)


def pointer_attention_ref(decoder_state, encoder_outputs, mask, w1_t, w2_t, vt_w):
    """Pure-JAX reference mirroring the PyTorch forward."""
    enc_t = encoder_outputs @ w1_t                                    # [B, Te, H]
    dec_t = decoder_state @ w2_t                                      # [B, Td, H]
    combined = jnp.tanh(enc_t[:, None, :, :] + dec_t[:, :, None, :])  # [B, Td, Te, H]
    prod = jnp.einsum("bteh,h->bte", combined, vt_w[0])               # [B, Td, Te]
    return prod + mask, prod


if __name__ == "__main__":
    # Small but TPU-friendly shapes: Te = 128 keeps output stores lane-dense;
    # Td = 32 with td_tile = 16 exercises multiple Td tiles per batch element.
    B, Td, Te, H = 2, 32, 128, 32

    key = jax.random.PRNGKey(0)
    k_dec, k_enc, k_mask, k_w1, k_w2, k_vt = jax.random.split(key, 6)

    decoder_state = jax.random.normal(k_dec, (B, Td, H), dtype=jnp.float32)
    encoder_outputs = jax.random.normal(k_enc, (B, Te, H), dtype=jnp.float32)
    # mask: additive log-mask (0 for keep, -1e9 for masked), like the module expects.
    mask = jnp.where(jax.random.uniform(k_mask, (B, Td, Te)) > 0.2, 0.0, -1e9).astype(jnp.float32)

    # nn.Linear(bias=False) default init: U(-1/sqrt(fan_in), +1/sqrt(fan_in)).
    bound = 1.0 / (H ** 0.5)
    w1_t = jax.random.uniform(k_w1, (H, H), minval=-bound, maxval=bound, dtype=jnp.float32)
    w2_t = jax.random.uniform(k_w2, (H, H), minval=-bound, maxval=bound, dtype=jnp.float32)
    vt_w = jax.random.uniform(k_vt, (1, H), minval=-bound, maxval=bound, dtype=jnp.float32)

    masked, score = pointer_attention(decoder_state, encoder_outputs, mask,
                                      w1_t, w2_t, vt_w, td_tile=16)
    jax.block_until_ready((masked, score))

    ref_masked, ref_score = pointer_attention_ref(
        decoder_state, encoder_outputs, mask, w1_t, w2_t, vt_w)

    assert jnp.allclose(score, ref_score, atol=1e-4, rtol=1e-4), "log_score mismatch"
    assert jnp.allclose(masked, ref_masked, atol=1e-4, rtol=1e-4), "log_score_masked mismatch"

    # TODO(synk): the use_cross_attn_ptr_net=True branch (scaled key @ query^T) is not
    # implemented here; this kernel covers the module's default additive-attention path.
    print("KERNEL_OK")
</pallas_src>

<mosaic_0001>
module attributes {stable_mosaic.version = 11 : i64} {
  func.func @_pointer_attention_kernel(%arg0: i32, %arg1: i32, %arg2: memref<1x16x32xf32, #tpu.memory_space<vmem>>, %arg3: memref<1x32x128xf32, #tpu.memory_space<vmem>>, %arg4: memref<1x16x128xf32, #tpu.memory_space<vmem>>, %arg5: memref<32x1xf32, #tpu.memory_space<vmem>>, %arg6: memref<1x16x128xf32, #tpu.memory_space<vmem>>, %arg7: memref<1x16x128xf32, #tpu.memory_space<vmem>>) attributes {dimension_semantics = [#tpu.dimension_semantics<parallel>, #tpu.dimension_semantics<parallel>], iteration_bounds = array<i64: 2, 2>, scalar_prefetch = 0 : i64, scratch_operands = 0 : i64, tpu.core_type = #tpu.core_type<tc>, window_params = [{transform_indices = @transform_0, window_bounds = array<i64: 1, 16, 32>}, {transform_indices = @transform_1, window_bounds = array<i64: 1, 32, 128>}, {transform_indices = @transform_2, window_bounds = array<i64: 1, 16, 128>}, {pipeline_mode = #tpu.pipeline_mode<synchronous>, transform_indices = @transform_3, window_bounds = array<i64: 32, 1>}, {transform_indices = @transform_4, window_bounds = array<i64: 1, 16, 128>}, {transform_indices = @transform_5, window_bounds = array<i64: 1, 16, 128>}]} {
    %cst = arith.constant 0.000000e+00 : f32
    %0 = vector.broadcast %cst : f32 to vector<16x128xf32>
    %c0 = arith.constant 0 : index
    %c0_0 = arith.constant 0 : index
    %c0_1 = arith.constant 0 : index
    %1 = vector.load %arg2[%c0, %c0_0, %c0_1] : memref<1x16x32xf32, #tpu.memory_space<vmem>>, vector<1x16x32xf32>
    %2 = vector.shape_cast %1 : vector<1x16x32xf32> to vector<16x32xf32>
    %c0_2 = arith.constant 0 : index
    %c0_3 = arith.constant 0 : index
    %c0_4 = arith.constant 0 : index
    %3 = vector.load %arg3[%c0_2, %c0_3, %c0_4] : memref<1x32x128xf32, #tpu.memory_space<vmem>>, vector<1x32x128xf32>
    %4 = vector.shape_cast %3 : vector<1x32x128xf32> to vector<32x128xf32>
    %c0_5 = arith.constant 0 : index
    %c0_6 = arith.constant 0 : index
    %5 = vector.load %arg5[%c0_5, %c0_6] : memref<32x1xf32, #tpu.memory_space<vmem>>, vector<32x1xf32>
    %6 = vector.shape_cast %2 : vector<16x32xf32> to vector<16x32x1xf32>
    %7 = vector.shape_cast %4 : vector<32x128xf32> to vector<1x32x128xf32>
    %8 = vector.broadcast %6 : vector<16x32x1xf32> to vector<16x32x128xf32>
    %9 = vector.broadcast %7 : vector<1x32x128xf32> to vector<16x32x128xf32>
    %10 = arith.addf %8, %9 : vector<16x32x128xf32>
    %11 = math.tanh %10 : vector<16x32x128xf32>
    %12 = vector.shape_cast %5 : vector<32x1xf32> to vector<1x32x1xf32>
    %13 = vector.broadcast %12 : vector<1x32x1xf32> to vector<16x32x128xf32>
    %14 = arith.mulf %11, %13 : vector<16x32x128xf32>
    %cst_7 = arith.constant dense<0.000000e+00> : vector<16x128xf32>
    %15 = vector.multi_reduction <add>, %14, %cst_7 [1] : vector<16x32x128xf32> to vector<16x128xf32>
    %16 = arith.addf %0, %15 : vector<16x128xf32>
    %c0_8 = arith.constant 0 : index
    %c0_9 = arith.constant 0 : index
    %c0_10 = arith.constant 0 : index
    %17 = vector.load %arg7[%c0_8, %c0_9, %c0_10] : memref<1x16x128xf32, #tpu.memory_space<vmem>>, vector<1x16x128xf32>
    %18 = vector.shape_cast %17 : vector<1x16x128xf32> to vector<16x128xf32>
    %19 = vector.shape_cast %16 : vector<16x128xf32> to vector<1x16x128xf32>
    tpu.vector_store %arg7[%c0_8, %c0_9, %c0_10], %19 {strides = array<i32>} : memref<1x16x128xf32, #tpu.memory_space<vmem>>, vector<1x16x128xf32>,
    %c0_11 = arith.constant 0 : index
    %c0_12 = arith.constant 0 : index
    %c0_13 = arith.constant 0 : index
    %20 = vector.load %arg4[%c0_11, %c0_12, %c0_13] : memref<1x16x128xf32, #tpu.memory_space<vmem>>, vector<1x16x128xf32>
    %21 = vector.shape_cast %20 : vector<1x16x128xf32> to vector<16x128xf32>
    %22 = arith.addf %16, %21 : vector<16x128xf32>
    %c0_14 = arith.constant 0 : index
    %c0_15 = arith.constant 0 : index
    %c0_16 = arith.constant 0 : index
    %23 = vector.load %arg6[%c0_14, %c0_15, %c0_16] : memref<1x16x128xf32, #tpu.memory_space<vmem>>, vector<1x16x128xf32>
    %24 = vector.shape_cast %23 : vector<1x16x128xf32> to vector<16x128xf32>
    %25 = vector.shape_cast %22 : vector<16x128xf32> to vector<1x16x128xf32>
    tpu.vector_store %arg6[%c0_14, %c0_15, %c0_16], %25 {strides = array<i32>} : memref<1x16x128xf32, #tpu.memory_space<vmem>>, vector<1x16x128xf32>,
    return
  }
  func.func @transform_0(%arg0: i32, %arg1: i32) -> (i32, i32, i32) {
    %c0_i32 = arith.constant 0 : i32
    %c0_i32_0 = arith.constant 0 : i32
    return %arg0, %arg1, %c0_i32 : i32, i32, i32
  }
  func.func @transform_1(%arg0: i32, %arg1: i32) -> (i32, i32, i32) {
    %c0_i32 = arith.constant 0 : i32
    %c0_i32_0 = arith.constant 0 : i32
    %c0_i32_1 = arith.constant 0 : i32
    return %arg0, %c0_i32, %c0_i32_0 : i32, i32, i32
  }
  func.func @transform_2(%arg0: i32, %arg1: i32) -> (i32, i32, i32) {
    %c0_i32 = arith.constant 0 : i32
    %c0_i32_0 = arith.constant 0 : i32
    return %arg0, %arg1, %c0_i32 : i32, i32, i32
  }
  func.func @transform_3(%arg0: i32, %arg1: i32) -> (i32, i32) {
    %c0_i32 = arith.constant 0 : i32
    %c0_i32_0 = arith.constant 0 : i32
    %c0_i32_1 = arith.constant 0 : i32
    return %c0_i32, %c0_i32_0 : i32, i32
  }
  func.func @transform_4(%arg0: i32, %arg1: i32) -> (i32, i32, i32) {
    %c0_i32 = arith.constant 0 : i32
    %c0_i32_0 = arith.constant 0 : i32
    return %arg0, %arg1, %c0_i32 : i32, i32, i32
  }
  func.func @transform_5(%arg0: i32, %arg1: i32) -> (i32, i32, i32) {
    %c0_i32 = arith.constant 0 : i32
    %c0_i32_0 = arith.constant 0 : i32
    return %arg0, %arg1, %c0_i32 : i32, i32, i32
  }
}

</mosaic_0001>

<bundles_post_ra>
// kernel: tpu_custom_call.1
= control target key start
LH: loop header
LB: loop body
LE: loop exit
PB: predicated region body
PF: predicated region fallthrough
CT: control target
= control target key end

     0   :  { %s2987_s0 = inlined_call_operand.hbm [shape: f32[2,32,32], index: 0, kind: input, shape index: {}]   ;;  %s2988_s1 = inlined_call_operand.hbm [shape: f32[2,32,128], index: 1, kind: input, shape index: {}]   ;;  %s2989_s2 = inlined_call_operand.hbm [shape: f32[2,32,128], index: 2, kind: input, shape index: {}]   ;;  %s2990_s3 = inlined_call_operand.vmem [shape: f32[32,1], index: 3, kind: input, shape index: {}]   ;;  %s2991_s4 = inlined_call_operand.hbm [shape: f32[2,32,128], index: 4, kind: output, shape index: {0}]   ;;  %s2992_s5 = inlined_call_operand.hbm [shape: f32[2,32,128], index: 5, kind: output, shape index: {1}]  }
   0x1   :  { %3016 = sst [smem:[#allocation25_spill]] %s2987_s0 }
   0x2   :  { %3017 = sst [smem:[#allocation26_spill]] %s2988_s1 }
   0x3   :  { %3018 = sst [smem:[#allocation27_spill]] %s2990_s3 }
   0x4   :  { %3019 = sst [smem:[#allocation28_spill]] %s2991_s4 }
   0x5   :  { %3020 = sst [smem:[#allocation29_spill]] %s2992_s5 }
   0x6   :  { %11 = vsyncpa [#allocation3], 0 }
   0x7   :  { %13 = vsyncpa [#allocation3 + $0x1], 0 }
   0x8   :  { %14 = vsyncpa [#allocation6], 0 }
   0x9   :  { %16 = vsyncpa [#allocation6 + $0x1], 0 }
   0xa   :  { %17 = vsyncpa [#allocation4], 0 }
   0xb   :  { %19 = vsyncpa [#allocation4 + $0x1], 0 }
   0xc   :  { %20 = vsyncpa [#allocation10], 0 }
   0xd   :  { %22 = vsyncpa [#allocation10 + $0x1], 0  ;;  %s1972_s18 = smov 0   ;;  %s1974_s19 = smov 0  }
   0xe   :  { %s1976_s20 = smov 0   ;;  %s1978_s21 = smov 0  }
   0xf   :  { %s1980_s22 = smov 0   ;;  %s1982_s23 = smov 0  }
  0x10   :  { %s1984_s24 = smov 0   ;;  %s1986_s25 = smov 0  }
  0x11   :  { %s1988_s26 = smov 0   ;;  %s1990_s27 = smov 0  }
  0x12   :  { %s1992_s28 = smov 0  }
  0x13 LB: > { %3021 = sst [smem:[#allocation16_spill]] %s1902_s21  ;;  %s2026_s29 = sadd.s32 4294967295, %s1930_s28   ;;  %s1930_s28 = sphi %s1992_s28, %s28_s28   ;;  %s1926_s27 = sphi %s1990_s27, %s3088_s27   ;;  %s1922_s26 = sphi %s1988_s26, %s3087_s26   ;;  %s1918_s25 = sphi %s1986_s25, %s3086_s25   ;;  %s1914_s24 = sphi %s1984_s24, %s3085_s24   ;;  %s1910_s23 = sphi %s1982_s23, %s3084_s23   ;;  %s1906_s22 = sphi %s1980_s22, %s3083_s22   ;;  %s1902_s21 = sphi %s1978_s21, %s3082_s21   ;;  %s1898_s20 = sphi %s1976_s20, %s3081_s20   ;;  %s1894_s19 = sphi %s1974_s19, %s3080_s19   ;;  %s1890_s18 = sphi %s1972_s18, %s3079_s18  }
  0x14   : > { %3022 = sst [smem:[#allocation17_spill]] %s1914_s24  ;;  %s40_s30 = sadd.s32 1, %s1926_s27 }
  0x15   : > { %3023 = sst [smem:[#allocation18_spill]] %s1918_s25  ;;  %p2995_p0 = scmp.eq.s32.totalorder %s1930_s28, 0 }
  0x16   : > { %p2994_p1 = scmp.eq.s32.totalorder %s2026_s29, 0  ;;  %p82_p2 = scmp.ne.s32.totalorder %s1898_s20, %s1894_s19 }
  0x17   : > { %p88_p3 = scmp.ne.s32.totalorder %s1894_s19, %s1890_s18  ;;  %p2993_p5 = scmp.lt.s32.totalorder %s1930_s28, 4 }
  0x18   : > { %p84_p4 = por %p82_p2, %p2995_p0  ;;  %s243_s8 = sand.u32 1, %s1930_s28  }
  0x19   : > { %p2040_p6 = por %p88_p3, %p2994_p1  ;;  %s245_s9 = sand.u32 1, %s1898_s20  }
  0x1a   : > { %s1402_s10 = sshll.u32 %s245_s9, 5  ;;  %s1425_s11 = sshll.u32 %s1926_s27, 9 }
  0x1b   : > { %s3024_s7 = scalar_select %p2040_p6, 1, 0 }
  0x1c   : > { %s3025_s1 = sld [smem:[#allocation26_spill]]  ;;  %s247_s15 = scalar_lea.vmem [#allocation5], %s1402_s10 }
  0x1d   : > { %s254_s16 = sshll.u32 %s247_s15, 4  ;;  %p2054_p7 = pnand %p2993_p5, %p84_p4  ;;  %s2058_s16 = int_to_ptr.vmem [resolvable:$true] %s254_s16 }
  0x1e   : > { %s2062_s18 = scalar_lea.sflag [#allocation6], %s243_s8 }
  0x1f   : > { %p1680_p11 = pneg %p2054_p7 }
  0x22   : > { %s2050_s14 = scalar_lea.hbm %s3025_s1, %s1425_s11  ;;  %s1683_s12 = scalar_lea.hbm %s3025_s1, 1024 }
  0x23   : > { %s1678_s9 = scalar_lea.hbm %s2050_s14, 512  ;;  %p1684_p2 = scmp.lt.u32.totalorder %s2050_s14, %s3025_s1 }
  0x24   : > { %p1679_p10 = scmp.ne.s32.totalorder %s2050_s14, %s1678_s9  ;;  %p1685_p3 = scmp.lt.u32.totalorder %s1683_s12, %s1678_s9 }
  0x25   : > { %p1687_p5 = scmp.lt.u32.totalorder %s1678_s9, %s2050_s14 }
  0x26   : > { %p1681_p12 = pnand %p1680_p11, %p1679_p10  ;;  %p1686_p4 = por %p1685_p3, %p1684_p2 }
  0x28   : > { %p1682_p13 = pneg %p1681_p12  ;;  %p1688_p1 = por %p1687_p5, %p1686_p4 }
  0x2a   : > { %p1689_p0 = pnand %p1688_p1, %p1682_p13 }
  0x2c   : > { %1692 = shalt.err (!%p1689_p0)
}
  0x2d   : > { %s1693_s8 = scalar_lea.vmem %s2058_s16, 512  ;;  %s1932_s10 = smov [#allocation5]  }
  0x2e   : > { %p1694_p10 = scmp.ne.s32.totalorder %s2058_s16, %s1693_s8  ;;  %s1698_s11 = sshll.u32 %s1932_s10, 4  ;;  %s1699_s11 = int_to_ptr.vmem [resolvable:$false] %s1698_s11 }
  0x2f   : > { %s1700_s13 = scalar_lea.vmem %s1699_s11, 1024  ;;  %p1701_p9 = scmp.lt.s32.totalorder %s2058_s16, %s1699_s11 }
  0x30   : > { %p1696_p12 = pnand %p1694_p10, %p1680_p11  ;;  %p1702_p2 = scmp.lt.s32.totalorder %s1700_s13, %s1693_s8 }
  0x32   : > { %p1697_p8 = pneg %p1696_p12  ;;  %p1703_p3 = por %p1702_p2, %p1701_p9 }
  0x34   : > { %p1704_p5 = pnand %p1703_p3, %p1697_p8 }
  0x36   : > { %1707 = shalt.err (!%p1704_p5)
}
  0x37   : > { %s2996_s9 = smov 128   ;;  %s2998_s12 = smov 8  }
  0x38   : > { %1442 = dma.hbm_to_vmem [thread:$0]  (!%p2054_p7), %s2050_s14, 512, %s2058_s16, %s2062_s18, %s2996_s9, %s2996_s9, %s2998_s12  }
  0x39   : > { %p3027_p0 = scmp.lt.s32.totalorder %s1930_s28, 5  ;;  %p3028_p1 = scmp.ge.s32.totalorder %s1930_s28, 1 }
  0x3a   : > { %s1395_s8 = sadd.s32 4294967294, %s1930_s28   ;;  %s37_s10 = sadd.s32 1, %s1922_s26 }
  0x3b   : > { %p2097_p8 = pnand %p3028_p1, %p3027_p0  ;;  %s49_s11 = sadd.s32 1, %s1910_s23 }
  0x3c   : > { %p38_p9 = scmp.ge.s32.totalorder %s37_s10, 2  ;;  %p56_p11 = scmp.ne.s32.totalorder %s1910_s23, %s1906_s22 }
  0x3d   : > { %p62_p13 = scmp.ne.s32.totalorder %s1906_s22, %s1902_s21  ;;  %p163_p4 = scmp.eq.s32.totalorder %s2026_s29, 3 }
  0x3e   : > { %s3090_s10 = smov (%p38_p9, %s37_s10), 0  ;;  %s3092_s30 = smov (!%p38_p9, %s40_s30), %s1926_s27 }
  0x3f   : > { %3030 = sst [smem:[#allocation19_spill]] %s3090_s10  ;;  %s45_s14 = ssub.s32 %s1922_s26, %s3090_s10 }
  0x40   : > { %p3031_p7 = scmp.eq.s32.totalorder %s1930_s28, 0  ;;  %p42_p12 = scmp.ge.s32.totalorder %s3092_s30, 2 }
  0x41   : > { %p3033_p2 = scmp.eq.s32.totalorder %s2026_s29, 0  ;;  %p2128_p5 = por %p163_p4, %p56_p11 }
  0x42   : > { %p2118_p10 = por %p3031_p7, %p56_p11  ;;  %p169_p0 = scmp.eq.s32.totalorder %s1395_s8, 3 }
  0x43   : > { %p2124_p3 = por %p3033_p2, %p62_p13  ;;  %s3094_s30 = smov (%p42_p12, %s3092_s30), 0 }
  0x44   : > { %s3035_s13 = scalar_select %p2128_p5, 1, 0 }
  0x45   : > { %s3034_s17 = scalar_select %p2124_p3, 1, 0 }
  0x46   : > { %3036 = sst [smem:[#allocation20_spill]] %s3035_s13  ;;  %p2134_p1 = por %p169_p0, %p62_p13 }
  0x47   : > { %3037 = sst [smem:[#allocation21_spill]] %s3094_s30  ;;  %s220_s12 = sand.u32 1, %s1910_s23  }
  0x48   : > { %s3038_s9 = scalar_select %p2134_p1, 1, 0 }
  0x49   : > { %s44_s6 = ssub.s32 %s1926_s27, %s3094_s30  ;;  %s2141_s10 = sshll.u32 %s220_s12, 4 }
  0x4a   : > { %3039 = sst [smem:[#allocation22_spill]] %s3038_s9  ;;  %s46_s1 = sor.u32 %s45_s14, %s44_s6 }
  0x4b   : > { %p73_p9 = scmp.eq.s32.totalorder %s44_s6, 0  ;;  %p47_p7 = scmp.eq.s32.totalorder %s46_s1, 0 }
  0x4c   : > { %s3040_s21 = sadd.s32 1, %s1898_s20  ;;  %s1399_s4 = sshll.u32 %s1922_s26, 1 }
  0x4d   : > { %s2146_s5 = scalar_select %p73_p9, %s1898_s20, %s3040_s21  }
  0x4e   : > { %s2149_s8 = scalar_select %p47_p7, %s1910_s23, %s49_s11  }
  0x4f   : > { %s1400_s13 = sshll.u32 %s1926_s27, 2  ;;  %s224_s25 = scalar_lea.vmem [#allocation2], %s2141_s10 }
  0x50   : > { %s233_s24 = sshll.u32 %s224_s25, 4  ;;  %s230_s9 = sadd.s32 %s1400_s13, %s1399_s4  ;;  %s2154_s24 = int_to_ptr.vmem [resolvable:$true] %s233_s24 }
  0x51   : > { %s1401_s3 = sshll.u32 %s230_s9, 7  ;;  %p3041_p11 = scmp.lt.s32.totalorder %s1930_s28, 4 }
  0x52   : > { %s3043_s0 = sld [smem:[#allocation25_spill]]  ;;  %s2172_s4 = scalar_lea.hbm %s2989_s2, %s1401_s3 }
  0x53   : > { %p2160_p13 = pnand %p3041_p11, %p2118_p10  ;;  %s2174_s25 = scalar_lea.sflag [#allocation3], %s220_s12 }
  0x55   : > { %p1710_p10 = pneg %p2160_p13 }
  0x58   : > { %s2167_s21 = scalar_lea.hbm %s3043_s0, %s1401_s3  ;;  %s1713_s30 = scalar_lea.hbm %s3043_s0, 1024 }
  0x59   : > { %s1708_s9 = scalar_lea.hbm %s2167_s21, 256  ;;  %p1714_p0 = scmp.lt.u32.totalorder %s2167_s21, %s3043_s0 }
  0x5a   : > { %p1709_p4 = scmp.ne.s32.totalorder %s2167_s21, %s1708_s9  ;;  %p1715_p9 = scmp.lt.u32.totalorder %s1713_s30, %s1708_s9 }
  0x5b   : > { %p1717_p11 = scmp.lt.u32.totalorder %s1708_s9, %s2167_s21 }
  0x5c   : > { %p1711_p12 = pnand %p1710_p10, %p1709_p4  ;;  %p1716_p7 = por %p1715_p9, %p1714_p0 }
  0x5e   : > { %p1712_p2 = pneg %p1711_p12  ;;  %p1718_p1 = por %p1717_p11, %p1716_p7 }
  0x60   : > { %p1719_p5 = pnand %p1718_p1, %p1712_p2 }
  0x62   : > { %1722 = shalt.err (!%p1719_p5)
}
  0x63   : > { %s1723_s3 = scalar_lea.vmem %s2154_s24, 256  ;;  %s1935_s12 = smov [#allocation2]  }
  0x64   : > { %p1724_p4 = scmp.ne.s32.totalorder %s2154_s24, %s1723_s3  ;;  %s1728_s11 = sshll.u32 %s1935_s12, 4  ;;  %s1729_s11 = int_to_ptr.vmem [resolvable:$false] %s1728_s11 }
  0x65   : > { %s1730_s16 = scalar_lea.vmem %s1729_s11, 512  ;;  %p1731_p3 = scmp.lt.s32.totalorder %s2154_s24, %s1729_s11 }
  0x66   : > { %p1726_p12 = pnand %p1724_p4, %p1710_p10  ;;  %p1732_p0 = scmp.lt.s32.totalorder %s1730_s16, %s1723_s3 }
  0x68   : > { %p1727_p6 = pneg %p1726_p12  ;;  %p1733_p9 = por %p1732_p0, %p1731_p3 }
  0x6a   : > { %p1734_p7 = pnand %p1733_p9, %p1727_p6 }
  0x6c   : > { %1737 = shalt.err (!%p1734_p7)
}
  0x6d   : > { %s3044_s9 = smov 8   ;;  %s3045_s13 = smov 128  }
  0x6e   : > { %1439 = dma.hbm_to_vmem [thread:$0]  (!%p2160_p13), %s2167_s21, 256, %s2154_s24, %s2174_s25, %s3045_s13, %s3045_s13, %s3044_s9  }
  0x6f   : > { %s268_s30 = scalar_lea.vmem [#allocation7], %s2141_s10  ;;  %s1738_s14 = scalar_lea.hbm %s2172_s4, 256 }
  0x70   : > { %s277_s6 = sshll.u32 %s268_s30, 4  ;;  %p1739_p6 = scmp.ne.s32.totalorder %s2172_s4, %s1738_s14  ;;  %s2206_s6 = int_to_ptr.vmem [resolvable:$true] %s277_s6 }
  0x71   : > { %s1743_s11 = scalar_lea.hbm %s2989_s2, 1024  ;;  %p1744_p1 = scmp.lt.u32.totalorder %s2172_s4, %s2989_s2 }
  0x72   : > { %p1741_p3 = pnand %p1739_p6, %p1710_p10  ;;  %p1745_p2 = scmp.lt.u32.totalorder %s1743_s11, %s1738_s14 }
  0x73   : > { %p1747_p4 = scmp.lt.u32.totalorder %s1738_s14, %s2172_s4 }
  0x74   : > { %p1742_p5 = pneg %p1741_p3  ;;  %p1746_p11 = por %p1745_p2, %p1744_p1 }
  0x76   : > { %p1748_p12 = por %p1747_p4, %p1746_p11 }
  0x78   : > { %p1749_p0 = pnand %p1748_p12, %p1742_p5 }
  0x7a   : > { %1752 = shalt.err (!%p1749_p0)
}
  0x7b   : > { %s1753_s24 = scalar_lea.vmem %s2206_s6, 256  ;;  %s1936_s10 = smov [#allocation7]  }
  0x7c   : > { %p1754_p9 = scmp.ne.s32.totalorder %s2206_s6, %s1753_s24  ;;  %s1758_s21 = sshll.u32 %s1936_s10, 4  ;;  %s1759_s21 = int_to_ptr.vmem [resolvable:$false] %s1758_s21 }
  0x7d   : > { %s1760_s0 = scalar_lea.vmem %s1759_s21, 512  ;;  %p1761_p3 = scmp.lt.s32.totalorder %s2206_s6, %s1759_s21 }
  0x7e   : > { %p1756_p7 = pnand %p1754_p9, %p1710_p10  ;;  %p1762_p1 = scmp.lt.s32.totalorder %s1760_s0, %s1753_s24 }
  0x80   : > { %p1757_p6 = pneg %p1756_p7  ;;  %p1763_p2 = por %p1762_p1, %p1761_p3 }
  0x82   : > { %p1764_p11 = pnand %p1763_p2, %p1757_p6 }
  0x84   : > { %1767 = shalt.err (!%p1764_p11)
}
  0x85   : > { %1445 = dma.hbm_to_vmem [thread:$0]  (!%p2160_p13), %s2172_s4, 256, %s2206_s6, %s2062_s18, %s3045_s13, %s3045_s13, %s3044_s9  }
  0x86   : > { %289 = sbr.rel (%p2097_p8) target bundleno = 517 (0x205), region = 36 }
  0x8d   : > { %s2238_s25 = sand.u32 1, %s1906_s22   ;;  %p3046_p10 = scmp.ne.s32.totalorder %s3034_s17, 0 }
  0x8e   : > { %s2241_s30 = sshll.u32 %s2238_s25, 4  ;;  %s292_s1 = scalar_lea.sflag [#allocation3], %s2238_s25 }
  0x8f   : > { %s295_s14 = scalar_lea.vmem [#allocation2], %s2241_s30 }
  0x90   : > { %1869 = dma.done.wait (%p3046_p10), %s292_s1, 256  }
  0x91   : > { %1871 = vsyncadd (%p3046_p10), %s292_s1, 4294967040  ;;  %s300_s18 = sand.u32 1, %s2026_s29   ;;  %s302_s15 = sand.u32 1, %s1894_s19  }
  0x92   : > { %s1411_s4 = sshll.u32 %s302_s15, 5  ;;  %s301_s9 = scalar_lea.sflag [#allocation6], %s300_s18 }
  0x93   : > { %s2251_s13 = scalar_lea.vmem [#allocation5], %s1411_s4  ;;  %p3047_p8 = scmp.ne.s32.totalorder %s3024_s7, 0 }
  0x95   : > { %1873 = dma.done.wait (%p3047_p8), %s301_s9, 512  }
  0x96   : > { %1875 = vsyncadd (%p3047_p8), %s301_s9, 4294966784  ;;  %s313_s6 = scalar_lea.vmem [#allocation7], %s2241_s30 }
  0x97   : > { %1877 = dma.done.wait (%p3046_p10), %s301_s9, 256  }
  0x98   : > { %1879 = vsyncadd (%p3046_p10), %s301_s9, 4294967040  ;;  %v369_v0 = vlaneseq  ;;  %v1937_v1 = vmov 0   ;;  %v359_v4 = vld [vmem:[%s295_s14] sm:$0xff]  ;;  %v360_v19 = vld [vmem:[%s295_s14 + $0x8] sm:$0xff]  ;;  %s3048_s17 = sld [smem:[#allocation27_spill]]  ;;  %vm1061_vm0 = vcmask 1041409  }
  0x99   : > { %1548 = vset.pattern.permute.xlu1 %v1937_v1  ;;  %1549 = vset.pattern.permute.xlu0 %v1937_v1  ;;  %v2339_v1 = vld [vmem:[%s2251_s13 + $0x10] sm:$0xff]  ;;  %vm1063_vm1 = vcmask 1042434   ;;  %vm1065_vm2 = vcmask 1043459   ;;  %vm1067_vm3 = vcmask 1044484   ;;  %vm1069_vm4 = vcmask 1045509   ;;  %s3059_s21 = sld [smem:[#allocation17_spill]] }
  0x9a   : > { %v2262_v2 = vshrl.u32 %v369_v0, 7  ;;  %vm1071_vm5 = vcmask 1046534   ;;  %s3061_s0 = sld [smem:[#allocation18_spill]]  ;;  %vm1073_vm6 = vcmask 1047559   ;;  %s347_s15 = scalar_lea.vmem [#allocation8], %s2241_s30 }
  0x9b   : > { %s1205_s4 = sshll.u32 %s347_s15, 4  ;;  %s3069_s29 = sld [smem:[#allocation20_spill]]  ;;  %s2848_s4 = int_to_ptr.vmem [resolvable:$true] %s1205_s4 }
  0x9c   : > { %v371_v3 = vsub.s32 0, %v2262_v2  ;;  %v485_v5 = vsub.s32 6, %v2262_v2  ;;  %v504_v6 = vsub.s32 7, %v2262_v2  ;;  %v390_v8 = vsub.s32 1, %v2262_v2  ;;  %s3070_s12 = sld [smem:[#allocation28_spill]]  ;;  %s3071_s24 = sld [smem:[#allocation29_spill]] }
  0x9d   : > { %v409_v12 = vsub.s32 2, %v2262_v2  ;;  %v428_v14 = vsub.s32 3, %v2262_v2  ;;  %v447_v16 = vsub.s32 4, %v2262_v2  ;;  %v466_v18 = vsub.s32 5, %v2262_v2  ;;  %v2342_v2 = vld [vmem:[%s2251_s13] sm:$0xff] }
  0x9e   : > { %v372_v7 = vrot.slane %v359_v4, %v371_v3  ;;  %v2272_v9 = vrot.slane %v359_v4, %v485_v5  ;;  %v2276_v10 = vrot.slane %v359_v4, %v504_v6  ;;  %v391_v11 = vrot.slane %v359_v4, %v390_v8  ;;  %v365_v29 = vld [vmem:[%s3048_s17] sm:$0xff]  ;;  %v366_v30 = vld [vmem:[%s3048_s17 + $0x8] sm:$0xff]  ;;  %v367_v35 = vld [vmem:[%s3048_s17 + $0x10] sm:$0xff] }
  0x9f   : > { %v410_v13 = vrot.slane %v359_v4, %v409_v12  ;;  %v429_v15 = vrot.slane %v359_v4, %v428_v14  ;;  %v448_v17 = vrot.slane %v359_v4, %v447_v16  ;;  %v543_v20 = vrot.slane %v360_v19, %v390_v8  ;;  %v368_v40 = vld [vmem:[%s3048_s17 + $0x18] sm:$0xff]  ;;  %s1417_s1 = sshll.u32 %s3059_s21, 1 }
  0xa0   : > { %382 = vbcast.lane.b32.xlu1 %v372_v7, 272  ;;  %374 = vbcast.lane.b32.xlu0 %v372_v7, 256  ;;  %v467_v21 = vrot.slane %v359_v4, %v466_v18  ;;  %v562_v22 = vrot.slane %v360_v19, %v409_v12  ;;  %v524_v23 = vrot.slane %v360_v19, %v371_v3  ;;  %s1418_s14 = sshll.u32 %s3061_s0, 2  ;;  %s1185_s0 = scalar_lea.sflag [#allocation4], %s2238_s25 }
  0xa1   : > { %v581_v24 = vrot.slane %v360_v19, %v428_v14  ;;  %v600_v25 = vrot.slane %v360_v19, %v447_v16  ;;  %v619_v26 = vrot.slane %v360_v19, %v466_v18  ;;  %v638_v27 = vrot.slane %v360_v19, %v485_v5  ;;  %v2349_v5 = vld [vmem:[%s2251_s13 + $0x18] sm:$0xff]  ;;  %s2826_s18 = sadd.s32 %s1418_s14, %s1417_s1  ;;  %s1768_s1 = scalar_lea.vmem %s2848_s4, 256 }
  0xa2   : > { %v657_v28 = vrot.slane %v360_v19, %v504_v6  ;;  %s1419_s9 = sshll.u32 %s2826_s18, 7  ;;  %s3072_s10 = smov %s3071_s24 }
  0xa3   : > { %s2868_s11 = scalar_lea.hbm %s3070_s12, %s1419_s9  ;;  %s2886_s21 = scalar_lea.hbm %s3071_s24, %s1419_s9 }
  0xa4   : > { %386 = vbcast.lane.b32.xlu1 %v372_v7, 280  ;;  %378 = vbcast.lane.b32.xlu0 %v372_v7, 264  ;;  %v2353_v7 = vld [vmem:[%s2251_s13 + $0x8] sm:$0xff]  ;;  %s2861_s13 = scalar_lea.vmem [#allocation9], %s2241_s30  ;;  %p1769_p13 = scmp.ne.s32.totalorder %s2848_s4, %s1768_s1 }
  0xa5   : > { %p3073_p5 = scmp.ne.s32.totalorder %s3069_s29, 0  ;;  %s1938_s14 = smov [#allocation8]  }
  0xa6   : > { %s1772_s18 = sshll.u32 %s1938_s14, 4  ;;  %s1773_s18 = int_to_ptr.vmem [resolvable:$false] %s1772_s18 }
  0xa7   : > { %p1770_p4 = pnand %p1769_p13, %p3073_p5  ;;  %p1775_p0 = scmp.lt.s32.totalorder %s2848_s4, %s1773_s18 }
  0xa8   : > { %397 = vbcast.lane.b32.xlu1 %v391_v11, 264  ;;  %393 = vbcast.lane.b32.xlu0 %v391_v11, 256 }
  0xa9   : > { %p1771_p12 = pneg %p1770_p4 }
  0xac   : > { %405 = vbcast.lane.b32.xlu1 %v391_v11, 280  ;;  %401 = vbcast.lane.b32.xlu0 %v391_v11, 272 }
  0xb0   : > { %416 = vbcast.lane.b32.xlu1 %v410_v13, 264  ;;  %412 = vbcast.lane.b32.xlu0 %v410_v13, 256 }
  0xb4   : > { %424 = vbcast.lane.b32.xlu1 %v410_v13, 280  ;;  %420 = vbcast.lane.b32.xlu0 %v410_v13, 272 }
  0xb8   : > { %435 = vbcast.lane.b32.xlu1 %v429_v15, 264  ;;  %431 = vbcast.lane.b32.xlu0 %v429_v15, 256 }
  0xbc   : > { %443 = vbcast.lane.b32.xlu1 %v429_v15, 280  ;;  %439 = vbcast.lane.b32.xlu0 %v429_v15, 272 }
  0xc0   : > { %454 = vbcast.lane.b32.xlu1 %v448_v17, 264  ;;  %450 = vbcast.lane.b32.xlu0 %v448_v17, 256 }
  0xc4   : > { %462 = vbcast.lane.b32.xlu1 %v448_v17, 280  ;;  %458 = vbcast.lane.b32.xlu0 %v448_v17, 272 }
  0xc8   : > { %545 = vbcast.lane.b32.xlu1 %v543_v20, 256  ;;  %469 = vbcast.lane.b32.xlu0 %v467_v21, 256 }
  0xcc   : > { %564 = vbcast.lane.b32.xlu1 %v562_v22, 256  ;;  %549 = vbcast.lane.b32.xlu0 %v543_v20, 264 }
  0xd0   : > { %526 = vbcast.lane.b32.xlu1 %v524_v23, 256  ;;  %568 = vbcast.lane.b32.xlu0 %v562_v22, 264 }
  0xd4   : > { %553 = vbcast.lane.b32.xlu1 %v543_v20, 272  ;;  %530 = vbcast.lane.b32.xlu0 %v524_v23, 264 }
  0xd8   : > { %587 = vbcast.lane.b32.xlu1 %v581_v24, 264  ;;  %583 = vbcast.lane.b32.xlu0 %v581_v24, 256 }
  0xdc   : > { %602 = vbcast.lane.b32.xlu1 %v600_v25, 256  ;;  %572 = vbcast.lane.b32.xlu0 %v562_v22, 272 }
  0xe0   : > { %473 = vbcast.lane.b32.xlu1 %v467_v21, 264  ;;  %606 = vbcast.lane.b32.xlu0 %v600_v25, 264 }
  0xe4   : > { %557 = vbcast.lane.b32.xlu1 %v543_v20, 280  ;;  %534 = vbcast.lane.b32.xlu0 %v524_v23, 272 }
  0xe8   : > { %621 = vbcast.lane.b32.xlu1 %v619_v26, 256  ;;  %591 = vbcast.lane.b32.xlu0 %v581_v24, 272 }
  0xec   : > { %488 = vbcast.lane.b32.xlu1 %v2272_v9, 256  ;;  %625 = vbcast.lane.b32.xlu0 %v619_v26, 264 }
  0xf0   : > { %576 = vbcast.lane.b32.xlu1 %v562_v22, 280  ;;  %492 = vbcast.lane.b32.xlu0 %v2272_v9, 264 }
  0xf4   : > { %640 = vbcast.lane.b32.xlu1 %v638_v27, 256  ;;  %610 = vbcast.lane.b32.xlu0 %v600_v25, 272 }
  0xf8   : > { %477 = vbcast.lane.b32.xlu1 %v467_v21, 272  ;;  %644 = vbcast.lane.b32.xlu0 %v638_v27, 264 }
  0xfc   : > { %511 = vbcast.lane.b32.xlu1 %v2276_v10, 264  ;;  %507 = vbcast.lane.b32.xlu0 %v2276_v10, 256 }
 0x100   : > { %595 = vbcast.lane.b32.xlu1 %v581_v24, 280  ;;  %538 = vbcast.lane.b32.xlu0 %v524_v23, 280 }
 0x104   : > { %659 = vbcast.lane.b32.xlu1 %v657_v28, 256  ;;  %629 = vbcast.lane.b32.xlu0 %v619_v26, 272 }
 0x108   : > { %803 = vperm.xlu1 %1548, %v365_v29   ;;  %663 = vbcast.lane.b32.xlu0 %v657_v28, 264 }
 0x10c   : > { %496 = vbcast.lane.b32.xlu1 %v2272_v9, 272  ;;  %808 = vperm.xlu0 %1549, %v366_v30  }
 0x110   : > { %614 = vbcast.lane.b32.xlu1 %v600_v25, 280  ;;  %648 = vbcast.lane.b32.xlu0 %v638_v27, 272 }
 0x112   : > { %v383_v31 = vpop.permute.xlu1 %382  ;;  %v375_v32 = vpop.permute.xlu0 %374 }
 0x113   : > { %v675_v6 = vadd.f32 %v383_v31, %v2339_v1  ;;  %v673_v8 = vadd.f32 %v375_v32, %v2342_v2 }
 0x114   : > { %481 = vbcast.lane.b32.xlu1 %v467_v21, 280  ;;  %515 = vbcast.lane.b32.xlu0 %v2276_v10, 272 }
 0x115   : > { %1550 = vtanh.f32 %v675_v6 }
 0x116   : > { %v387_v33 = vpop.permute.xlu1 %386  ;;  %v379_v34 = vpop.permute.xlu0 %378  ;;  %1552 = vtanh.f32 %v673_v8 }
 0x117   : > { %v674_v12 = vadd.f32 %v379_v34, %v2353_v7 }
 0x118   : > { %633 = vbcast.lane.b32.xlu1 %v619_v26, 280  ;;  %667 = vbcast.lane.b32.xlu0 %v657_v28, 272 }
 0x11a   : > { %v398_v36 = vpop.permute.xlu1 %397  ;;  %v394_v37 = vpop.permute.xlu0 %393 }
 0x11b   : > { %v678_v13 = vadd.f32 %v398_v36, %v2353_v7  ;;  %v677_v14 = vadd.f32 %v394_v37, %v2342_v2 }
 0x11c   : > { %813 = vperm.xlu1 %1548, %v367_v35   ;;  %500 = vbcast.lane.b32.xlu0 %v2272_v9, 280  ;;  %v676_v9 = vadd.f32 %v387_v33, %v2349_v5 }
 0x11e   : > { %v406_v38 = vpop.permute.xlu1 %405  ;;  %v402_v39 = vpop.permute.xlu0 %401  ;;  %1554 = vtanh.f32 %v676_v9 }
 0x11f   : > { %v680_v15 = vadd.f32 %v406_v38, %v2349_v5  ;;  %1556 = vtanh.f32 %v674_v12  ;;  %v679_v18 = vadd.f32 %v402_v39, %v2339_v1 }
 0x120   : > { %519 = vbcast.lane.b32.xlu0 %v2276_v10, 280  ;;  %652 = vbcast.lane.b32.xlu1 %v638_v27, 280  ;;  %1558 = vtanh.f32 %v678_v13  ;;  %v2380_v27 = vpop.eup %1550 }
 0x121   : > { %1560 = vtanh.f32 %v677_v14  ;;  %v2385_v30 = vpop.eup %1552 }
 0x122   : > { %v417_v41 = vpop.permute.xlu1 %416  ;;  %v413_v42 = vpop.permute.xlu0 %412  ;;  %1562 = vtanh.f32 %v680_v15 }
 0x123   : > { %v682_v19 = vadd.f32 %v417_v41, %v2353_v7  ;;  %v681_v20 = vadd.f32 %v413_v42, %v2342_v2  ;;  %1564 = vtanh.f32 %v679_v18 }
 0x124   : > { %818 = vperm.xlu0 %1549, %v368_v40   ;;  %671 = vbcast.lane.b32.xlu1 %v657_v28, 280 }
 0x125   : > { %1566 = vtanh.f32 %v682_v19 }
 0x126   : > { %v425_v43 = vpop.permute.xlu1 %424  ;;  %v421_v44 = vpop.permute.xlu0 %420  ;;  %1568 = vtanh.f32 %v681_v20 }
 0x127   : > { %v684_v21 = vadd.f32 %v425_v43, %v2349_v5  ;;  %v683_v23 = vadd.f32 %v421_v44, %v2339_v1 }
 0x128   : > { %v2388_v32 = vpop.eup %1554 }
 0x129   : > { %1570 = vtanh.f32 %v684_v21  ;;  %v2391_v34 = vpop.eup %1556 }
 0x12a   : > { %v436_v45 = vpop.permute.xlu1 %435  ;;  %v432_v46 = vpop.permute.xlu0 %431  ;;  %1572 = vtanh.f32 %v683_v23 }
 0x12b   : > { %v686_v25 = vadd.f32 %v436_v45, %v2353_v7  ;;  %v685_v26 = vadd.f32 %v432_v46, %v2342_v2  ;;  %v2397_v37 = vpop.eup %1558 }
 0x12c   : > { %v2403_v40 = vpop.eup %1560 }
 0x12d   : > { %1574 = vtanh.f32 %v686_v25  ;;  %v2407_v42 = vpop.eup %1562 }
 0x12e   : > { %v444_v47 = vpop.permute.xlu1 %443  ;;  %v440_v48 = vpop.permute.xlu0 %439  ;;  %1576 = vtanh.f32 %v685_v26 }
 0x12f   : > { %v688_v28 = vadd.f32 %v444_v47, %v2349_v5  ;;  %v687_v31 = vadd.f32 %v440_v48, %v2339_v1  ;;  %v2411_v44 = vpop.eup %1564 }
 0x130   : > { %v2415_v46 = vpop.eup %1566 }
 0x131   : > { %1578 = vtanh.f32 %v688_v28  ;;  %v2419_v48 = vpop.eup %1568 }
 0x132   : > { %v455_v49 = vpop.permute.xlu1 %454  ;;  %v2308_v50 = vpop.permute.xlu0 %450  ;;  %1580 = vtanh.f32 %v687_v31 }
 0x133   : > { %v690_v33 = vadd.f32 %v455_v49, %v2353_v7  ;;  %v689_v35 = vadd.f32 %v2308_v50, %v2342_v2 }
 0x135   : > { %1582 = vtanh.f32 %v690_v33 }
 0x136   : > { %v2310_v51 = vpop.permute.xlu1 %462  ;;  %v2312_v52 = vpop.permute.xlu0 %458  ;;  %1584 = vtanh.f32 %v689_v35 }
 0x137   : > { %v692_v38 = vadd.f32 %v2310_v51, %v2349_v5  ;;  %v691_v41 = vadd.f32 %v2312_v52, %v2339_v1  ;;  %v2427_v52 = vpop.eup %1570 }
 0x139   : > { %1586 = vtanh.f32 %v692_v38 }
 0x13a   : > { %v2314_v53 = vpop.permute.xlu1 %545  ;;  %v2316_v54 = vpop.permute.xlu0 %469  ;;  %1588 = vtanh.f32 %v691_v41 }
 0x13b   : > { %v709_v43 = vadd.f32 %v2314_v53, %v2342_v2  ;;  %v693_v45 = vadd.f32 %v2316_v54, %v2342_v2  ;;  %v2431_v54 = vpop.eup %1572 }
 0x13c   : > { %v2435_v6 = vpop.eup %1574 }
 0x13d   : > { %1590 = vtanh.f32 %v709_v43  ;;  %v2439_v8 = vpop.eup %1576 }
 0x13e   : > { %v2318_v55 = vpop.permute.xlu1 %564  ;;  %v2320_v56 = vpop.permute.xlu0 %549  ;;  %1592 = vtanh.f32 %v693_v45 }
 0x13f   : > { %v713_v47 = vadd.f32 %v2318_v55, %v2342_v2  ;;  %v710_v49 = vadd.f32 %v2320_v56, %v2353_v7  ;;  %v2443_v12 = vpop.eup %1578 }
 0x140   : > { %v2447_v13 = vpop.eup %1580 }
 0x141   : > { %1594 = vtanh.f32 %v713_v47  ;;  %v2451_v15 = vpop.eup %1582 }
 0x142   : > { %v2322_v57 = vpop.permute.xlu1 %526  ;;  %v2324_v58 = vpop.permute.xlu0 %568  ;;  %1596 = vtanh.f32 %v710_v49 }
 0x143   : > { %v705_v53 = vadd.f32 %v2322_v57, %v2342_v2  ;;  %v714_v55 = vadd.f32 %v2324_v58, %v2353_v7  ;;  %v2455_v18 = vpop.eup %1584 }
 0x144   : > { %v2459_v19 = vpop.eup %1586 }
 0x145   : > { %1598 = vtanh.f32 %v705_v53  ;;  %v2463_v20 = vpop.eup %1588 }
 0x146   : > { %v2326_v59 = vpop.permute.xlu1 %553  ;;  %v2328_v60 = vpop.permute.xlu0 %530  ;;  %1600 = vtanh.f32 %v714_v55 }
 0x147   : > { %v711_v56 = vadd.f32 %v2326_v59, %v2339_v1  ;;  %v706_v9 = vadd.f32 %v2328_v60, %v2353_v7  ;;  %v2467_v23 = vpop.eup %1590 }
 0x148   : > { %v2471_v25 = vpop.eup %1592 }
 0x149   : > { %1602 = vtanh.f32 %v711_v56 }
 0x14a   : > { %v2330_v61 = vpop.permute.xlu1 %587  ;;  %v2332_v62 = vpop.permute.xlu0 %583  ;;  %1604 = vtanh.f32 %v706_v9 }
 0x14b   : > { %v718_v57 = vadd.f32 %v2330_v61, %v2353_v7  ;;  %v717_v58 = vadd.f32 %v2332_v62, %v2342_v2  ;;  %v2475_v28 = vpop.eup %1594 }
 0x14c   : > { %v2479_v31 = vpop.eup %1596 }
 0x14d   : > { %1606 = vtanh.f32 %v718_v57 }
 0x14e   : > { %v2334_v63 = vpop.permute.xlu1 %602  ;;  %v2336_v0 = vpop.permute.xlu0 %572  ;;  %1608 = vtanh.f32 %v717_v58 }
 0x14f   : > { %v721_v60 = vadd.f32 %v2334_v63, %v2342_v2  ;;  %v715_v61 = vadd.f32 %v2336_v0, %v2339_v1  ;;  %v2483_v33 = vpop.eup %1598 }
 0x150   : > { %v2487_v35 = vpop.eup %1600 }
 0x151   : > { %1610 = vtanh.f32 %v721_v60 }
 0x152   : > { %v2344_v3 = vpop.permute.xlu1 %473  ;;  %v2346_v4 = vpop.permute.xlu0 %606  ;;  %1612 = vtanh.f32 %v715_v61 }
 0x153   : > { %v694_v62 = vadd.f32 %v2344_v3, %v2353_v7  ;;  %v722_v21 = vadd.f32 %v2346_v4, %v2353_v7  ;;  %v2491_v41 = vpop.eup %1602 }
 0x154   : > { %v2495_v43 = vpop.eup %1604 }
 0x155   : > { %1614 = vtanh.f32 %v694_v62 }
 0x156   : > { %v2357_v10 = vpop.permute.xlu1 %557  ;;  %v2359_v11 = vpop.permute.xlu0 %534  ;;  %1616 = vtanh.f32 %v722_v21 }
 0x157   : > { %v712_v63 = vadd.f32 %v2357_v10, %v2349_v5  ;;  %v707_v0 = vadd.f32 %v2359_v11, %v2339_v1  ;;  %v2499_v47 = vpop.eup %1606 }
 0x158   : > { %v2503_v49 = vpop.eup %1608 }
 0x159   : > { %1618 = vtanh.f32 %v712_v63 }
 0x15a   : > { %v2365_v16 = vpop.permute.xlu1 %621  ;;  %v2367_v17 = vpop.permute.xlu0 %591  ;;  %1620 = vtanh.f32 %v707_v0 }
 0x15b   : > { %v725_v4 = vadd.f32 %v2365_v16, %v2342_v2  ;;  %v719_v10 = vadd.f32 %v2367_v17, %v2339_v1  ;;  %v2507_v53 = vpop.eup %1610 }
 0x15c   : > { %v2510_v55 = vpop.eup %1612 }
 0x15d   : > { %1622 = vtanh.f32 %v725_v4 }
 0x15e   : > { %v2373_v22 = vpop.permute.xlu0 %625  ;;  %v2376_v24 = vpop.permute.xlu1 %488  ;;  %1624 = vtanh.f32 %v719_v10  ;;  %v2540_v10 = vld [vmem:[%s313_s6 + $0x8] sm:$0xff] }
 0x15f   : > { %v697_v11 = vadd.f32 %v2376_v24, %v2342_v2  ;;  %v726_v38 = vadd.f32 %v2373_v22, %v2353_v7  ;;  %v2514_v9 = vpop.eup %1614  ;;  %3050 = vst [vmem:[#allocation24_spill] sm:$0xff] %v2540_v10 }
 0x160   : > { %v2517_v57 = vpop.eup %1616 }
 0x161   : > { %1626 = vtanh.f32 %v697_v11 }
 0x162   : > { %v2383_v29 = vpop.permute.xlu0 %492  ;;  %v2395_v36 = vpop.permute.xlu1 %576  ;;  %1628 = vtanh.f32 %v726_v38 }
 0x163   : > { %v716_v16 = vadd.f32 %v2395_v36, %v2349_v5  ;;  %v698_v17 = vadd.f32 %v2383_v29, %v2353_v7 }
 0x165   : > { %1630 = vtanh.f32 %v716_v16 }
 0x166   : > { %v2401_v39 = vpop.permute.xlu0 %610  ;;  %v2423_v50 = vpop.permute.xlu1 %640  ;;  %1632 = vtanh.f32 %v698_v17 }
 0x167   : > { %v729_v22 = vadd.f32 %v2423_v50, %v2342_v2  ;;  %v723_v36 = vadd.f32 %v2401_v39, %v2339_v1 }
 0x169   : > { %1634 = vtanh.f32 %v729_v22 }
 0x16a   : > { %v2425_v51 = vpop.permute.xlu0 %644  ;;  %v478_v14 = vpop.permute.xlu1 %477  ;;  %1636 = vtanh.f32 %v723_v36 }
 0x16b   : > { %v695_v29 = vadd.f32 %v478_v14, %v2339_v1  ;;  %v730_v56 = vadd.f32 %v2425_v51, %v2353_v7  ;;  %v2520_v14 = vpop.eup %1618  ;;  %v2525_v51 = vld [vmem:[%s313_s6] sm:$0xff]  ;;  %s1223_s6 = sshll.u32 %s2861_s13, 4  ;;  %s2888_s6 = int_to_ptr.vmem [resolvable:$true] %s1223_s6 }
 0x16c   : > { %3049 = vst [vmem:[#allocation23_spill] sm:$0xff] %v2525_v51  ;;  %v2527_v62 = vpop.eup %1620 }
 0x16d   : > { %1638 = vtanh.f32 %v695_v29  ;;  %v2530_v63 = vpop.eup %1622 }
 0x16e   : > { %v508_v59 = vpop.permute.xlu0 %507  ;;  %v512_v26 = vpop.permute.xlu1 %511  ;;  %1640 = vtanh.f32 %v730_v56 }
 0x16f   : > { %v702_v50 = vadd.f32 %v512_v26, %v2353_v7  ;;  %v701_v39 = vadd.f32 %v508_v59, %v2342_v2  ;;  %v2533_v0 = vpop.eup %1624 }
 0x171   : > { %1642 = vtanh.f32 %v702_v50 }
 0x172   : > { %v539_v3 = vpop.permute.xlu0 %538  ;;  %v596_v45 = vpop.permute.xlu1 %595  ;;  %1644 = vtanh.f32 %v701_v39 }
 0x173   : > { %v720_v61 = vadd.f32 %v596_v45, %v2349_v5  ;;  %v708_v21 = vadd.f32 %v539_v3, %v2349_v5  ;;  %v2544_v3 = vpop.eup %1626 }
 0x174   : > { %v2549_v45 = vpop.eup %1628 }
 0x175   : > { %1646 = vtanh.f32 %v720_v61  ;;  %v2554_v29 = vpop.eup %1630 }
 0x176   : > { %v630_v24 = vpop.permute.xlu0 %629  ;;  %v660_v58 = vpop.permute.xlu1 %659  ;;  %1648 = vtanh.f32 %v708_v21 }
 0x177   : > { %v733_v26 = vadd.f32 %v660_v58, %v2342_v2  ;;  %v727_v16 = vadd.f32 %v630_v24, %v2339_v1  ;;  %v1633_v39 = vpop.eup %1632 }
 0x178   : > { %v2564_v22 = vpop.eup %1634 }
 0x179   : > { %v2571_v24 = vpop.eup %1636 }
 0x17a   : > { %v664_v60 = vpop.permute.xlu0 %663 }
 0x17b   : > { %v734_v59 = vadd.f32 %v664_v60, %v2353_v7 }
 0x17d   : > { %1650 = vtanh.f32 %v734_v59 }
 0x17e   : > { %1652 = vtanh.f32 %v733_v26 }
 0x17f   : > { %1654 = vtanh.f32 %v727_v16 }
 0x187   : > { %v2536_v4 = vpop.permute.xlu1 %803 }
 0x188   : > { %v821_v59 = vmul.f32 %v2385_v30, %v2536_v4  ;;  %v825_v50 = vmul.f32 %v2403_v40, %v2536_v4  ;;  %v2581_v30 = vpop.eup %1638  ;;  %v829_v26 = vmul.f32 %v2419_v48, %v2536_v4  ;;  %v833_v56 = vmul.f32 %v2439_v8, %v2536_v4 }
 0x18b   : > { %v497_v58 = vpop.permute.xlu1 %496  ;;  %v2559_v60 = vpop.permute.xlu0 %808 }
 0x18c   : > { %v822_v61 = vmul.f32 %v2391_v34, %v2559_v60  ;;  %v826_v21 = vmul.f32 %v2397_v37, %v2559_v60  ;;  %v830_v36 = vmul.f32 %v2415_v46, %v2559_v60  ;;  %v834_v16 = vmul.f32 %v2435_v6, %v2559_v60  ;;  %v1641_v37 = vpop.eup %1640 }
 0x18d   : > { %v699_v40 = vadd.f32 %v497_v58, %v2339_v1  ;;  %v838_v34 = vmul.f32 %v2451_v15, %v2559_v60  ;;  %v837_v46 = vmul.f32 %v2455_v18, %v2536_v4  ;;  %v853_v6 = vmul.f32 %v2483_v33, %v2536_v4  ;;  %v1643_v7 = vpop.eup %1642 }
 0x18e   : > { %v854_v58 = vmul.f32 %v2495_v43, %v2559_v60  ;;  %v858_v48 = vmul.f32 %v2479_v31, %v2559_v60  ;;  %v857_v15 = vmul.f32 %v2467_v23, %v2536_v4  ;;  %v862_v38 = vmul.f32 %v2487_v35, %v2559_v60  ;;  %v1645_v11 = vpop.eup %1644 }
 0x18f   : > { %v615_v2 = vpop.permute.xlu1 %614  ;;  %v649_v17 = vpop.permute.xlu0 %648  ;;  %v866_v18 = vmul.f32 %v2499_v47, %v2559_v60  ;;  %v2605_v33 = vadd.f32 %v822_v61, %v821_v59  ;;  %v2607_v10 = vadd.f32 %v826_v21, %v825_v50  ;;  %v2609_v43 = vadd.f32 %v830_v36, %v829_v26 }
 0x190   : > { %v731_v8 = vadd.f32 %v649_v17, %v2339_v1  ;;  %v2611_v31 = vadd.f32 %v834_v16, %v833_v56  ;;  %v2613_v51 = vpop.eup %1646  ;;  %1656 = vtanh.f32 %v699_v40  ;;  %v861_v23 = vmul.f32 %v2475_v28, %v2536_v4 }
 0x191   : > { %v865_v35 = vmul.f32 %v2503_v49, %v2536_v4  ;;  %v2619_v17 = vadd.f32 %v838_v34, %v837_v46  ;;  %v2621_v47 = vpop.eup %1648  ;;  %v841_v36 = vmul.f32 %v2471_v25, %v2536_v4  ;;  %v2625_v56 = vadd.f32 %v854_v58, %v853_v6 }
 0x192   : > { %1658 = vtanh.f32 %v731_v8  ;;  %v2627_v21 = vadd.f32 %v858_v48, %v857_v15  ;;  %v1651_v59 = vpop.eup %1650  ;;  %v724_v28 = vadd.f32 %v615_v2, %v2349_v5  ;;  %v2631_v49 = vadd.f32 %v862_v38, %v861_v23 }
 0x193   : > { %v482_v50 = vpop.permute.xlu1 %481  ;;  %v516_v61 = vpop.permute.xlu0 %515  ;;  %v2633_v16 = vadd.f32 %v866_v18, %v865_v35  ;;  %v842_v46 = vmul.f32 %v2514_v9, %v2559_v60  ;;  %v845_v25 = vmul.f32 %v2544_v3, %v2536_v4  ;;  %v849_v6 = vmul.f32 %v1645_v11, %v2536_v4 }
 0x194   : > { %v703_v26 = vadd.f32 %v516_v61, %v2339_v1  ;;  %v1653_v40 = vpop.eup %1652  ;;  %v696_v34 = vadd.f32 %v482_v50, %v2349_v5  ;;  %v846_v2 = vmul.f32 %v1633_v39, %v2559_v60  ;;  %v850_v48 = vmul.f32 %v1643_v7, %v2559_v60 }
 0x195   : > { %v1655_v58 = vpop.eup %1654  ;;  %v869_v38 = vmul.f32 %v2507_v53, %v2536_v4  ;;  %v870_v8 = vmul.f32 %v2517_v57, %v2559_v60  ;;  %v874_v9 = vmul.f32 %v2549_v45, %v2559_v60  ;;  %v878_v3 = vmul.f32 %v1641_v37, %v2559_v60 }
 0x196   : > { %1660 = vtanh.f32 %v703_v26  ;;  %v882_v11 = vmul.f32 %v1651_v59, %v2559_v60  ;;  %v873_v53 = vmul.f32 %v2530_v63, %v2536_v4  ;;  %v877_v57 = vmul.f32 %v2564_v22, %v2536_v4 }
 0x197   : > { %v634_v15 = vpop.permute.xlu1 %633  ;;  %v668_v18 = vpop.permute.xlu0 %667  ;;  %1662 = vtanh.f32 %v724_v28  ;;  %v881_v23 = vmul.f32 %v1653_v40, %v2536_v4  ;;  %v930_v35 = vadd.f32 %v842_v46, %v841_v36  ;;  %v939_v45 = vadd.f32 %v846_v2, %v845_v25 }
 0x198   : > { %v728_v39 = vadd.f32 %v634_v15, %v2349_v5  ;;  %v735_v7 = vadd.f32 %v668_v18, %v2339_v1  ;;  %1664 = vtanh.f32 %v696_v34  ;;  %v2658_v37 = vadd.f32 %v850_v48, %v849_v6 }
 0x199   : > { %v2660_v60 = vadd.f32 %v870_v8, %v869_v38  ;;  %v2662_v1 = vadd.f32 %v874_v9, %v873_v53  ;;  %v2664_v59 = vadd.f32 %v878_v3, %v877_v57  ;;  %v2666_v63 = vadd.f32 %v882_v11, %v881_v23 }
 0x19a   : > { %1666 = vtanh.f32 %v728_v39  ;;  %v1657_v28 = vpop.eup %1656 }
 0x19b   : > { %1668 = vtanh.f32 %v735_v7  ;;  %v814_v50 = vpop.permute.xlu1 %813  ;;  %v501_v61 = vpop.permute.xlu0 %500 }
 0x19c   : > { %v700_v22 = vadd.f32 %v501_v61, %v2349_v5  ;;  %v823_v4 = vmul.f32 %v2380_v27, %v814_v50  ;;  %v827_v36 = vmul.f32 %v2411_v44, %v814_v50  ;;  %v831_v26 = vmul.f32 %v2431_v54, %v814_v50  ;;  %v1659_v40 = vpop.eup %1658 }
 0x19d   : > { %v835_v34 = vmul.f32 %v2447_v13, %v814_v50  ;;  %v839_v46 = vmul.f32 %v2463_v20, %v814_v50  ;;  %v843_v25 = vmul.f32 %v2581_v30, %v814_v50  ;;  %v847_v6 = vmul.f32 %v1657_v28, %v814_v50 }
 0x19e   : > { %1670 = vtanh.f32 %v700_v22  ;;  %v855_v2 = vmul.f32 %v2527_v62, %v814_v50  ;;  %v859_v48 = vmul.f32 %v2491_v41, %v814_v50  ;;  %v863_v38 = vmul.f32 %v2510_v55, %v814_v50 }
 0x19f   : > { %v653_v27 = vpop.permute.xlu1 %652  ;;  %v520_v8 = vpop.permute.xlu0 %519  ;;  %v867_v44 = vmul.f32 %v2533_v0, %v814_v50  ;;  %v2680_v54 = vmul.f32 %v2571_v24, %v814_v50  ;;  %v2682_v13 = vmul.f32 %v1655_v58, %v814_v50  ;;  %v2684_v20 = vmul.f32 %v1659_v40, %v814_v50 }
 0x1a0   : > { %v732_v30 = vadd.f32 %v653_v27, %v2349_v5  ;;  %v704_v15 = vadd.f32 %v520_v8, %v2349_v5  ;;  %v886_v62 = vadd.f32 %v2605_v33, %v823_v4  ;;  %v895_v41 = vadd.f32 %v2607_v10, %v827_v36  ;;  %v1661_v55 = vpop.eup %1660 }
 0x1a1   : > { %v904_v18 = vadd.f32 %v2609_v43, %v831_v26  ;;  %v913_v0 = vadd.f32 %v2611_v31, %v835_v34  ;;  %v922_v24 = vadd.f32 %v2619_v17, %v839_v46  ;;  %v931_v9 = vadd.f32 %v930_v35, %v843_v25  ;;  %v1663_v58 = vpop.eup %1662 }
 0x1a2   : > { %1672 = vtanh.f32 %v732_v30  ;;  %v851_v3 = vmul.f32 %v1661_v55, %v814_v50  ;;  %v940_v11 = vadd.f32 %v939_v45, %v847_v6  ;;  %v958_v39 = vadd.f32 %v2625_v56, %v855_v2  ;;  %v1665_v7 = vpop.eup %1664 }
 0x1a3   : > { %1674 = vtanh.f32 %v704_v15  ;;  %v672_v53 = vpop.permute.xlu1 %671  ;;  %v819_v33 = vpop.permute.xlu0 %818  ;;  %v2695_v10 = vadd.f32 %v2627_v21, %v859_v48  ;;  %v2698_v43 = vadd.f32 %v2631_v49, %v863_v38  ;;  %v2701_v31 = vadd.f32 %v2633_v16, %v867_v44 }
 0x1a4   : > { %v1667_v17 = vpop.eup %1666  ;;  %v736_v57 = vadd.f32 %v672_v53, %v2349_v5  ;;  %v824_v23 = vmul.f32 %v2388_v32, %v819_v33  ;;  %v828_v56 = vmul.f32 %v2407_v42, %v819_v33  ;;  %v832_v35 = vmul.f32 %v2427_v52, %v819_v33 }
 0x1a5   : > { %v1669_v45 = vpop.eup %1668  ;;  %v836_v61 = vmul.f32 %v2443_v12, %v819_v33  ;;  %v840_v21 = vmul.f32 %v2459_v19, %v819_v33  ;;  %v844_v28 = vmul.f32 %v1665_v7, %v819_v33  ;;  %v856_v49 = vmul.f32 %v2621_v47, %v819_v33 }
 0x1a6   : > { %1676 = vtanh.f32 %v736_v57  ;;  %v2711_v16 = vmul.f32 %v2520_v14, %v819_v33  ;;  %v2714_v5 = vmul.f32 %v2554_v29, %v819_v33  ;;  %v2717_v32 = vmul.f32 %v2613_v51, %v819_v33 }
 0x1a7   : > { %v2719_v42 = vmul.f32 %v1663_v58, %v819_v33  ;;  %v2721_v52 = vmul.f32 %v1667_v17, %v819_v33  ;;  %v2723_v12 = vmul.f32 %v1669_v45, %v814_v50  ;;  %v887_v19 = vadd.f32 %v886_v62, %v824_v23 }
 0x1a8   : > { %v1671_v22 = vpop.eup %1670  ;;  %v896_v4 = vadd.f32 %v895_v41, %v828_v56  ;;  %v905_v47 = vadd.f32 %v904_v18, %v832_v35  ;;  %v914_v36 = vadd.f32 %v913_v0, %v836_v61  ;;  %v923_v26 = vadd.f32 %v922_v24, %v840_v21 }
 0x1a9   : > { %v848_v14 = vmul.f32 %v1671_v22, %v819_v33  ;;  %v888_v40 = vrot.slane %v887_v19, 4  ;;  %v932_v34 = vadd.f32 %v931_v9, %v844_v28  ;;  %v949_v29 = vadd.f32 %v2658_v37, %v851_v3 }
 0x1aa   : > { %v897_v46 = vrot.slane %v896_v4, 4  ;;  %v906_v51 = vrot.slane %v905_v47, 4  ;;  %v915_v25 = vrot.slane %v914_v36, 4  ;;  %v924_v6 = vrot.slane %v923_v26, 4 }
 0x1ab   : > { %v889_v2 = vadd.f32 %v888_v40, %v887_v19  ;;  %v933_v48 = vrot.slane %v932_v34, 4  ;;  %v941_v38 = vadd.f32 %v940_v11, %v848_v14  ;;  %v959_v50 = vadd.f32 %v958_v39, %v856_v49 }
 0x1ac   : > { %v1673_v27 = vpop.eup %1672  ;;  %v898_v8 = vadd.f32 %v897_v46, %v896_v4  ;;  %v907_v44 = vadd.f32 %v906_v51, %v905_v47  ;;  %v916_v30 = vadd.f32 %v915_v25, %v914_v36  ;;  %v925_v15 = vadd.f32 %v924_v6, %v923_v26 }
 0x1ad   : > { %v1675_v62 = vpop.eup %1674  ;;  %v2726_v41 = vmul.f32 %v1673_v27, %v819_v33  ;;  %v890_v55 = vrot.slane %v889_v2, 2  ;;  %v934_v18 = vadd.f32 %v933_v48, %v932_v34  ;;  %v942_v0 = vrot.slane %v941_v38, 4 }
 0x1ae   : > { %v852_v37 = vmul.f32 %v1675_v62, %v819_v33  ;;  %v899_v24 = vrot.slane %v898_v8, 2  ;;  %v908_v9 = vrot.slane %v907_v44, 2  ;;  %v917_v58 = vrot.slane %v916_v30, 2 }
 0x1af   : > { %v891_v3 = vadd.f32 %v890_v55, %v889_v2  ;;  %v926_v7 = vrot.slane %v925_v15, 2  ;;  %v935_v53 = vrot.slane %v934_v18, 2  ;;  %v943_v11 = vadd.f32 %v942_v0, %v941_v38 }
 0x1b0   : > { %v1677_v39 = vpop.eup %1676  ;;  %v900_v17 = vadd.f32 %v899_v24, %v898_v8  ;;  %v909_v57 = vadd.f32 %v908_v9, %v907_v44  ;;  %v918_v23 = vadd.f32 %v917_v58, %v916_v30  ;;  %v950_v56 = vadd.f32 %v949_v29, %v852_v37 }
 0x1b1   : > { %v2728_v35 = vmul.f32 %v1677_v39, %v819_v33  ;;  %v892_v45 = vrot.slane %v891_v3, 1  ;;  %v927_v61 = vadd.f32 %v926_v7, %v925_v15  ;;  %v936_v21 = vadd.f32 %v935_v53, %v934_v18 }
 0x1b2   : > { %v901_v28 = vrot.slane %v900_v17, 1  ;;  %v910_v49 = vrot.slane %v909_v57, 1  ;;  %v919_v19 = vrot.slane %v918_v23, 1  ;;  %v944_v22 = vrot.slane %v943_v11, 2 }
 0x1b3   : > { %v2730_v4 = vadd.f32 %v892_v45, %v891_v3  ;;  %v928_v47 = vrot.slane %v927_v61, 1  ;;  %v937_v36 = vrot.slane %v936_v21, 1  ;;  %v951_v26 = vrot.slane %v950_v56, 4 }
 0x1b4   : > { %v2732_v14 = vadd.f32 %v901_v28, %v900_v17  ;;  %v2734_v40 = vadd.f32 %v910_v49, %v909_v57  ;;  %v2736_v34 = vadd.f32 %v919_v19, %v918_v23  ;;  %v945_v33 = vadd.f32 %v944_v22, %v943_v11  ;;  %v3051_v19 = vld [vmem:[#allocation23_spill] sm:$0xff] }
 0x1b5   : > { %v2738_v29 = vadd.f32 %v928_v47, %v927_v61  ;;  %v2740_v46 = vadd.f32 %v937_v36, %v936_v21  ;;  %v952_v51 = vadd.f32 %v951_v26, %v950_v56  ;;  %v960_v25 = vrot.slane %v959_v50, 4 }
 0x1b6   : > { %v946_v6 = vrot.slane %v945_v33, 1  ;;  %v968_v2 = vadd.f32 %v2695_v10, %v2711_v16  ;;  %v977_v48 = vadd.f32 %v2698_v43, %v2714_v5  ;;  %v986_v38 = vadd.f32 %v2701_v31, %v2717_v32 }
 0x1b7   : > { %v953_v27 = vrot.slane %v952_v51, 2  ;;  %v961_v8 = vadd.f32 %v960_v25, %v959_v50  ;;  %v994_v44 = vadd.f32 %v2660_v60, %v2680_v54  ;;  %v1003_v30 = vadd.f32 %v2662_v1, %v2682_v13 }
 0x1b8   : > { %v2752_v15 = vadd.f32 %v946_v6, %v945_v33  ;;  %v969_v62 = vrot.slane %v968_v2, 4  ;;  %v978_v55 = vrot.slane %v977_v48, 4  ;;  %v987_v18 = vrot.slane %v986_v38, 4 }
 0x1b9   : > { %v954_v10 = vadd.f32 %v953_v27, %v952_v51  ;;  %v962_v16 = vrot.slane %v961_v8, 2  ;;  %v995_v43 = vadd.f32 %v994_v44, %v2719_v42  ;;  %v1004_v5 = vadd.f32 %v1003_v30, %v2721_v52 }
 0x1ba   : > { %v970_v31 = vadd.f32 %v969_v62, %v968_v2  ;;  %v979_v32 = vadd.f32 %v978_v55, %v977_v48  ;;  %v988_v50 = vadd.f32 %v987_v18, %v986_v38  ;;  %v1012_v60 = vadd.f32 %v2664_v59, %v2684_v20 }
 0x1bb   : > { %v955_v54 = vrot.slane %v954_v10, 1  ;;  %v963_v0 = vadd.f32 %v962_v16, %v961_v8  ;;  %v996_v1 = vrot.slane %v995_v43, 4  ;;  %v1005_v13 = vrot.slane %v1004_v5, 4 }
 0x1bc   : > { %v971_v37 = vrot.slane %v970_v31, 2  ;;  %v980_v24 = vrot.slane %v979_v32, 2  ;;  %v989_v9 = vrot.slane %v988_v50, 2  ;;  %v1013_v58 = vadd.f32 %v1012_v60, %v2726_v41 }
 0x1bd   : > { %v2759_v3 = vadd.f32 %v955_v54, %v954_v10  ;;  %v964_v42 = vrot.slane %v963_v0, 1  ;;  %v997_v7 = vadd.f32 %v996_v1, %v995_v43  ;;  %v1006_v52 = vadd.f32 %v1005_v13, %v1004_v5 }
 0x1be   : > { %v972_v53 = vadd.f32 %v971_v37, %v970_v31  ;;  %v981_v11 = vadd.f32 %v980_v24, %v979_v32  ;;  %v990_v39 = vadd.f32 %v989_v9, %v988_v50  ;;  %v1014_v17 = vrot.slane %v1013_v58, 4  ;;  %v3060_v50 = vld [vmem:[#allocation24_spill] sm:$0xff] }
 0x1bf   : > { %v2761_v57 = vadd.f32 %v964_v42, %v963_v0  ;;  %v998_v59 = vrot.slane %v997_v7, 2  ;;  %v1007_v20 = vrot.slane %v1006_v52, 2  ;;  %v1021_v23 = vadd.f32 %v2666_v63, %v2723_v12 }
 0x1c0   : > { %v973_v56 = vrot.slane %v972_v53, 1  ;;  %v982_v45 = vrot.slane %v981_v11, 1  ;;  %v991_v61 = vrot.slane %v990_v39, 1  ;;  %v1015_v41 = vadd.f32 %v1014_v17, %v1013_v58 }
 0x1c1   : > { %v999_v21 = vadd.f32 %v998_v59, %v997_v7  ;;  %v1008_v28 = vadd.f32 %v1007_v20, %v1006_v52  ;;  %v1022_v49 = vadd.f32 %v1021_v23, %v2728_v35  ;;  %v1120_v22 = vadd.f32 %v3051_v19, %v2730_v4 }
 0x1c2   : > { %v2768_v47 = vadd.f32 %v973_v56, %v972_v53  ;;  %v2770_v36 = vadd.f32 %v982_v45, %v981_v11  ;;  %v2772_v26 = vadd.f32 %v991_v61, %v990_v39  ;;  %v1016_v33 = vrot.slane %v1015_v41, 2 }
 0x1c3   : > { %v1000_v63 = vrot.slane %v999_v21, 1  ;;  %v1009_v12 = vrot.slane %v1008_v28, 1  ;;  %v1023_v51 = vrot.slane %v1022_v49, 4  ;;  %v3052_v25 = vrot.slane %v3051_v19, 1 }
 0x1c4   : > { %v1017_v6 = vadd.f32 %v1016_v33, %v1015_v41  ;;  %v3053_v2 = vrot.slane %v3051_v19, 2  ;;  %v3054_v38 = vrot.slane %v3051_v19, 3  ;;  %v3055_v8 = vrot.slane %v3051_v19, 4 }
 0x1c5   : > { %v1121_v35 = vadd.f32 %v3052_v25, %v2732_v14  ;;  %v2786_v30 = vadd.f32 %v1000_v63, %v999_v21  ;;  %v2788_v62 = vadd.f32 %v1009_v12, %v1008_v28  ;;  %v1024_v55 = vadd.f32 %v1023_v51, %v1022_v49 }
 0x1c6   : > { %v1122_v48 = vadd.f32 %v3053_v2, %v2734_v40  ;;  %v1123_v27 = vadd.f32 %v3054_v38, %v2736_v34  ;;  %v1124_v44 = vadd.f32 %v3055_v8, %v2738_v29  ;;  %v3056_v18 = vrot.slane %v3051_v19, 5 }
 0x1c7   : > { %v1018_v16 = vrot.slane %v1017_v6, 1  ;;  %v3057_v43 = vrot.slane %v3051_v19, 6  ;;  %v3058_v31 = vrot.slane %v3051_v19, 7  ;;  %v1128_v60 = vadd.f32 %v3060_v50, %v2761_v57 }
 0x1c8   : > { %v1125_v10 = vadd.f32 %v3056_v18, %v2740_v46  ;;  %v1025_v54 = vrot.slane %v1024_v55, 2  ;;  %v3062_v0 = vrot.slane %v3060_v50, 1  ;;  %v3063_v13 = vrot.slane %v3060_v50, 2 }
 0x1c9   : > { %v1126_v5 = vadd.f32 %v3057_v43, %v2752_v15  ;;  %v1127_v32 = vadd.f32 %v3058_v31, %v2759_v3  ;;  %v3064_v24 = vrot.slane %v3060_v50, 3  ;;  %v2810_v58 = vadd.f32 %v1018_v16, %v1017_v6 }
 0x1ca   : > { %v1129_v1 = vadd.f32 %v3062_v0, %v2768_v47  ;;  %v1130_v37 = vadd.f32 %v3063_v13, %v2770_v36  ;;  %v3065_v42 = vrot.slane %v3060_v50, 4  ;;  %v3066_v52 = vrot.slane %v3060_v50, 5 }
 0x1cb   : > { %v1131_v9 = vadd.f32 %v3064_v24, %v2772_v26  ;;  %v1152_v11 = vrot.slane %v1121_v35, 7  ;;  %v1026_v39 = vadd.f32 %v1025_v54, %v1024_v55  ;;  %v1154_v17 = vrot.slane %v1122_v48, 6 }
 0x1cc   : > { %v1132_v7 = vadd.f32 %v3065_v42, %v2786_v30  ;;  %v1133_v53 = vadd.f32 %v3066_v52, %v2788_v62  ;;  %v1156_v59 = vrot.slane %v1123_v27, 5  ;;  %v1158_v20 = vrot.slane %v1124_v44, 4 }
 0x1cd   : > { %v3067_v23 = vrot.slane %v3060_v50, 6  ;;  %v1153_v45 = vsel %vm1061_vm0, %v1152_v11, %v1120_v22  ;;  %v1160_v61 = vrot.slane %v1125_v10, 3  ;;  %v1162_v41 = vrot.slane %v1126_v5, 2 }
 0x1ce   : > { %v1027_v21 = vrot.slane %v1026_v39, 1  ;;  %v1155_v28 = vsel %vm1063_vm1, %v1154_v17, %v1153_v45  ;;  %v1164_v49 = vrot.slane %v1127_v32, 1  ;;  %v1166_v19 = vrot.slane %v1129_v1, 7 }
 0x1cf   : > { %v1134_v56 = vadd.f32 %v3067_v23, %v2810_v58  ;;  %v1157_v33 = vsel %vm1065_vm2, %v1156_v59, %v1155_v28  ;;  %v1168_v63 = vrot.slane %v1130_v37, 6  ;;  %v1170_v12 = vrot.slane %v1131_v9, 5 }
 0x1d0   : > { %v1172_v51 = vrot.slane %v1132_v7, 4  ;;  %v2828_v25 = vadd.f32 %v1027_v21, %v1026_v39  ;;  %v1159_v22 = vsel %vm1067_vm3, %v1158_v20, %v1157_v33  ;;  %v1167_v35 = vsel %vm1061_vm0, %v1166_v19, %v1128_v60 }
 0x1d1   : > { %v1174_v6 = vrot.slane %v1133_v53, 3  ;;  %v1161_v2 = vsel %vm1069_vm4, %v1160_v61, %v1159_v22  ;;  %v1169_v48 = vsel %vm1063_vm1, %v1168_v63, %v1167_v35  ;;  %v1176_v38 = vrot.slane %v1134_v56, 2 }
 0x1d2   : > { %v1062_v27 = vsel %vm1061_vm0, %v2732_v14, %v2730_v4  ;;  %v3068_v8 = vrot.slane %v3060_v50, 7  ;;  %v1163_v55 = vsel %vm1071_vm5, %v1162_v41, %v1161_v2  ;;  %v1171_v18 = vsel %vm1065_vm2, %v1170_v12, %v1169_v48 }
 0x1d3   : > { %v1064_v10 = vsel %vm1063_vm1, %v2734_v40, %v1062_v27  ;;  %v1165_v16 = vsel %vm1073_vm6, %v1164_v49, %v1163_v55  ;;  %v1173_v43 = vsel %vm1067_vm3, %v1172_v51, %v1171_v18  ;;  %v1075_v14 = vsel %vm1061_vm0, %v2768_v47, %v2761_v57 }
 0x1d4   : > { %v1135_v44 = vadd.f32 %v3068_v8, %v2828_v25  ;;  %v1066_v4 = vsel %vm1065_vm2, %v2736_v34, %v1064_v10  ;;  %v1175_v5 = vsel %vm1069_vm4, %v1174_v6, %v1173_v43  ;;  %1182 = vst [vmem:[%s347_s15] sm:$0xff] %v1165_v16  ;;  %v1076_v32 = vsel %vm1063_vm1, %v2770_v36, %v1075_v14 }
 0x1d5   : > { %v1068_v40 = vsel %vm1067_vm3, %v2738_v29, %v1066_v4  ;;  %v1177_v34 = vsel %vm1071_vm5, %v1176_v38, %v1175_v5  ;;  %v1077_v57 = vsel %vm1065_vm2, %v2772_v26, %v1076_v32 }
 0x1d6   : > { %v1178_v31 = vrot.slane %v1135_v44, 1  ;;  %v1070_v29 = vsel %vm1069_vm4, %v2740_v46, %v1068_v40  ;;  %v1078_v50 = vsel %vm1067_vm3, %v2786_v30, %v1077_v57 }
 0x1d7   : > { %v1072_v36 = vsel %vm1071_vm5, %v2752_v15, %v1070_v29  ;;  %v1079_v54 = vsel %vm1069_vm4, %v2788_v62, %v1078_v50 }
 0x1d8   : > { %v1179_v47 = vsel %vm1073_vm6, %v1178_v31, %v1177_v34  ;;  %v1074_v60 = vsel %vm1073_vm6, %v2759_v3, %v1072_v36 }
 0x1d9   : > { %1183 = vst [vmem:[%s347_s15 + $0x8] sm:$0xff] %v1179_v47  ;;  %s1774_s15 = scalar_lea.vmem %s1773_s18, 512 }
 0x1da   : > { %p1776_p9 = scmp.lt.s32.totalorder %s1774_s15, %s1768_s1 }
 0x1dc   : > { %p1777_p7 = por %p1776_p9, %p1775_p0 }
 0x1de   : > { %p1778_p6 = pnand %p1777_p7, %p1771_p12 }
 0x1e0   : > { %1781 = shalt.err (!%p1778_p6)
}
 0x1e1   : > { %s1782_s9 = scalar_lea.hbm %s2868_s11, 256  ;;  %s1786_s30 = scalar_lea.hbm %s3070_s12, 1024 }
 0x1e2   : > { %p1783_p3 = scmp.ne.s32.totalorder %s2868_s11, %s1782_s9  ;;  %p1787_p11 = scmp.lt.u32.totalorder %s2868_s11, %s3070_s12 }
 0x1e3   : > { %p1788_p10 = scmp.lt.u32.totalorder %s1786_s30, %s1782_s9  ;;  %p1790_p13 = scmp.lt.u32.totalorder %s1782_s9, %s2868_s11 }
 0x1e4   : > { %p1784_p1 = pnand %p1783_p3, %p3073_p5 }
 0x1e5   : > { %p1789_p8 = por %p1788_p10, %p1787_p11 }
 0x1e6   : > { %p1785_p2 = pneg %p1784_p1 }
 0x1e7   : > { %p1791_p4 = por %p1790_p13, %p1789_p8 }
 0x1e9   : > { %p1792_p12 = pnand %p1791_p4, %p1785_p2 }
 0x1eb   : > { %1795 = shalt.err (!%p1792_p12)
}
 0x1ec   : > { %s1939_s1 = smov 128   ;;  %s1940_s14 = smov 8   ;;  %v1080_v46 = vsel %vm1071_vm5, %v2810_v58, %v1079_v54  ;;  %1084 = vst [vmem:[%s2861_s13] sm:$0xff] %v1074_v60 }
 0x1ed   : > { %1432 = dma.vmem_to_hbm [thread:$0]  (%p3073_p5), %s2848_s4, 256, %s2868_s11, %s1185_s0, %s1939_s1, %s1939_s1, %s1940_s14   ;;  %v1081_v15 = vsel %vm1073_vm6, %v2828_v25, %v1080_v46 }
 0x1ee   : > { %1085 = vst [vmem:[%s2861_s13 + $0x8] sm:$0xff] %v1081_v15  ;;  %s1190_s18 = scalar_lea.sflag [#allocation10], %s2238_s25  ;;  %s1796_s15 = scalar_lea.vmem %s2888_s6, 256 }
 0x1ef   : > { %p1797_p0 = scmp.ne.s32.totalorder %s2888_s6, %s1796_s15  ;;  %s1941_s9 = smov [#allocation9]  }
 0x1f0   : > { %s1800_s7 = sshll.u32 %s1941_s9, 4  ;;  %s1801_s7 = int_to_ptr.vmem [resolvable:$false] %s1800_s7 }
 0x1f1   : > { %p1798_p9 = pnand %p1797_p0, %p3073_p5  ;;  %s1802_s3 = scalar_lea.vmem %s1801_s7, 512 }
 0x1f2   : > { %p1803_p6 = scmp.lt.s32.totalorder %s2888_s6, %s1801_s7  ;;  %p1804_p3 = scmp.lt.s32.totalorder %s1802_s3, %s1796_s15 }
 0x1f3   : > { %p1799_p7 = pneg %p1798_p9 }
 0x1f4   : > { %p1805_p1 = por %p1804_p3, %p1803_p6 }
 0x1f6   : > { %p1806_p2 = pnand %p1805_p1, %p1799_p7 }
 0x1f8   : > { %1809 = shalt.err (!%p1806_p2)
}
 0x1f9   : > { %s1810_s4 = scalar_lea.hbm %s2886_s21, 256  ;;  %s1814_s0 = scalar_lea.hbm %s3072_s10, 1024 }
 0x1fa   : > { %p1811_p11 = scmp.ne.s32.totalorder %s2886_s21, %s1810_s4  ;;  %p1815_p13 = scmp.lt.u32.totalorder %s2886_s21, %s3072_s10 }
 0x1fb   : > { %p1816_p4 = scmp.lt.u32.totalorder %s1814_s0, %s1810_s4  ;;  %p1818_p0 = scmp.lt.u32.totalorder %s1810_s4, %s2886_s21 }
 0x1fc   : > { %p1812_p10 = pnand %p1811_p11, %p3073_p5 }
 0x1fd   : > { %p1817_p12 = por %p1816_p4, %p1815_p13 }
 0x1fe   : > { %p1813_p8 = pneg %p1812_p10 }
 0x1ff   : > { %p1819_p9 = por %p1818_p0, %p1817_p12 }
 0x201   : > { %p1820_p7 = pnand %p1819_p9, %p1813_p8 }
 0x203   : > { %1823 = shalt.err (!%p1820_p7)
}
 0x204   : > { %1433 = dma.vmem_to_hbm [thread:$0]  (%p3073_p5), %s2888_s6, 256, %s2886_s21, %s1190_s18, %s1939_s1, %s1939_s1, %s1940_s14  }
 0x205 PF: > { %s3074_s24 = sld [smem:[#allocation16_spill]]  ;;  %s3075_s15 = sld [smem:[#allocation22_spill]] }
 0x206   : > { %p1454_p6 = scmp.ge.s32.totalorder %s1930_s28, 2 }
 0x20b   : > { %s1238_s9 = sand.u32 1, %s3074_s24   ;;  %p3076_p3 = scmp.ne.s32.totalorder %s3075_s15, 0 }
 0x20c   : > { %s1239_s7 = scalar_lea.sflag [#allocation4], %s1238_s9 }
 0x20d   : > { %p1447_p1 = pnand %p1454_p6, %p3076_p3 }
 0x20f   : > { %1881 = dma.done.wait (!%p1447_p1), %s1239_s7, 256  }
 0x210   : > { %1883 = vsyncadd (!%p1447_p1), %s1239_s7, 4294967040  ;;  %s1248_s29 = scalar_lea.sflag [#allocation10], %s1238_s9 }
 0x211   : > { %1885 = dma.done.wait (!%p1447_p1), %s1248_s29, 256  }
 0x212   : > { %1887 = vsyncadd (!%p1447_p1), %s1248_s29, 4294967040  ;;  %s28_s28 = sadd.s32 1, %s1930_s28   ;;  %s3077_s6 = sld [smem:[#allocation19_spill]] }
 0x213   : > { %p25_p2 = scmp.ge.s32.totalorder %s28_s28, 6   ;;  %s3078_s1 = sld [smem:[#allocation21_spill]] }
 0x214   : > { %s3079_s18 = smov %s1894_s19  ;;  %s3080_s19 = smov %s1898_s20 }
 0x215   : > { %s3081_s20 = smov %s2146_s5  ;;  %s3082_s21 = smov %s1906_s22 }
 0x216   : > { %s3083_s22 = smov %s1910_s23  ;;  %s3084_s23 = smov %s2149_s8 }
 0x217   : > { %s3085_s24 = smov %s1922_s26  ;;  %s3086_s25 = smov %s1926_s27 }
 0x218   : > { %s3087_s26 = smov %s3077_s6  ;;  %27 = sbr.rel (!%p25_p2) target bundleno = 19 (0x13), region = 122 }
 0x219   : > { %s3088_s27 = smov %s3078_s1 }
 0x21f   :  { %1253 = vsyncpa [#allocation3], 1 }
 0x220   :  { %1255 = vsyncpa [#allocation3 + $0x1], 1 }
 0x221   :  { %1256 = vsyncpa [#allocation6], 1 }
 0x222   :  { %1258 = vsyncpa [#allocation6 + $0x1], 1 }
 0x223   :  { %1259 = vsyncpa [#allocation4], 1 }
 0x224   :  { %1261 = vsyncpa [#allocation4 + $0x1], 1 }
 0x225   :  { %1262 = vsyncpa [#allocation10], 1 }
 0x226   :  { %1264 = vsyncpa [#allocation10 + $0x1], 1 }

</bundles_post_ra>
